<compile_context>
chip_gen: v5e
topology: v5e:2x2
jax: 0.10.0
libtpu: 0.0.40
codegen_flags: <defaults>
</compile_context>

<pallas_src>
import math
import functools

import jax
import jax.numpy as jnp
from jax import lax
from jax.experimental import pallas as pl
from jax.experimental.pallas import tpu as pltpu


def _mha_head_kernel(q_ref, k_ref, v_ref,
                     wq_ref, bq_ref, wk_ref, bk_ref, wv_ref, bv_ref,
                     wo_ref, bo_ref, out_ref, *, scale):
    """One grid step = (batch b, query-tile t, head h)."""
    h = pl.program_id(2)

    # bf16 MXU inputs, f32 accumulation.
    q_in = q_ref[0].astype(jnp.bfloat16)      # (TQ, D)
    k_in = k_ref[0].astype(jnp.bfloat16)      # (S,  D)
    v_in = v_ref[0].astype(jnp.bfloat16)      # (S,  D)

    # Per-head projections; weights arrive bf16 + head-major from the host.
    qh = jnp.dot(q_in, wq_ref[0], preferred_element_type=jnp.float32) + bq_ref[0]  # (TQ, dk)
    kh = jnp.dot(k_in, wk_ref[0], preferred_element_type=jnp.float32) + bk_ref[0]  # (S,  dk)
    vh = jnp.dot(v_in, wv_ref[0], preferred_element_type=jnp.float32) + bv_ref[0]  # (S,  dk)

    # scores = (q * scale) @ k^T without materializing a transpose:
    # contract d_k (dim 1) on both operands.
    scores = lax.dot_general(
        (qh * scale).astype(jnp.bfloat16), kh.astype(jnp.bfloat16),
        dimension_numbers=(((1,), (1,)), ((), ())),
        preferred_element_type=jnp.float32)                      # (TQ, S)

    # Numerically-stable softmax (f32); divide goes to the EUP reciprocal.
    m = jnp.max(scores, axis=-1, keepdims=True)
    p = jnp.exp(scores - m)
    l = jnp.sum(p, axis=-1, keepdims=True)
    probs = p * pl.reciprocal(l, approx=True)

    ctx = jnp.dot(probs.astype(jnp.bfloat16), vh.astype(jnp.bfloat16),
                  preferred_element_type=jnp.float32)            # (TQ, dk)

    # This head's slice of the output projection; heads summed via the grid.
    partial = jnp.dot(ctx.astype(jnp.bfloat16), wo_ref[0],
                      preferred_element_type=jnp.float32)        # (TQ, D)

    @pl.when(h == 0)
    def _():
        out_ref[0] = partial + bo_ref[...]     # fold output bias in once

    @pl.when(h != 0)
    def _():
        out_ref[0] += partial


def multi_head_attention(Q, K, V, params, *, num_heads, q_tile=None):
    B, S, D = Q.shape
    assert D % num_heads == 0, "d_model must be divisible by num_heads"
    dk = D // num_heads
    wq, bq, wk, bk, wv, bv, wo, bo = params

    # ---- host-side repack: head-major + bf16 weights -----------------------
    def head_major(w, b):
        w_h = w.reshape(D, num_heads, dk).transpose(1, 0, 2).astype(jnp.bfloat16)  # (H, D, dk)
        b_h = b.reshape(1, num_heads, dk).transpose(1, 0, 2).astype(jnp.float32)   # (H, 1, dk)
        return w_h, b_h

    wq_h, bq_h = head_major(wq, bq)
    wk_h, bk_h = head_major(wk, bk)
    wv_h, bv_h = head_major(wv, bv)
    wo_h = wo.reshape(num_heads, dk, D).astype(jnp.bfloat16)                        # (H, dk, D)
    bo_f = bo.astype(jnp.float32)                                                   # (1, D)

    # ---- query tiling: bound per-step VMEM, add pipeline depth -------------
    if q_tile is None:
        q_tile = S if (S <= 512 or S % 512 != 0) else 512
    assert S % q_tile == 0
    n_qt = S // q_tile
    grid = (B, n_qt, num_heads)

    q_spec     = pl.BlockSpec((1, q_tile, D), lambda b, t, h: (b, t, 0))
    kv_spec    = pl.BlockSpec((1, S, D),      lambda b, t, h: (b, 0, 0))
    w_in_spec  = pl.BlockSpec((1, D, dk),     lambda b, t, h: (h, 0, 0))
    b_in_spec  = pl.BlockSpec((1, 1, dk),     lambda b, t, h: (h, 0, 0))
    w_out_spec = pl.BlockSpec((1, dk, D),     lambda b, t, h: (h, 0, 0))
    b_out_spec = pl.BlockSpec((1, D),         lambda b, t, h: (0, 0))
    out_spec   = pl.BlockSpec((1, q_tile, D), lambda b, t, h: (b, t, 0))

    # ---- VMEM budget & cost hint -------------------------------------------
    blk_bytes = (q_tile * D * 4            # Q tile (f32)
                 + 2 * S * D * 4           # K, V (f32)
                 + 4 * D * dk * 2          # bf16 per-head weights
                 + (3 * dk + D) * 4        # f32 biases
                 + q_tile * D * 4)         # output tile (f32)
    interm_bytes = 3 * q_tile * S * 4 + 6 * q_tile * D * 4
    vmem_limit = int(min(max(2 * blk_bytes + interm_bytes + (4 << 20), 16 << 20),
                         64 << 20))

    cost = pl.CostEstimate(
        flops=8 * B * S * D * D + 4 * B * S * S * D,
        transcendentals=B * num_heads * S * S,
        bytes_accessed=4 * B * S * D * 4 + 4 * D * D * 2 + 4 * D * 4)

    kernel = functools.partial(_mha_head_kernel, scale=1.0 / math.sqrt(dk))

    return pl.pallas_call(
        kernel,
        out_shape=jax.ShapeDtypeStruct((B, S, D), jnp.float32),
        grid=grid,
        in_specs=[q_spec, kv_spec, kv_spec,
                  w_in_spec, b_in_spec,    # W_q, b_q
                  w_in_spec, b_in_spec,    # W_k, b_k
                  w_in_spec, b_in_spec,    # W_v, b_v
                  w_out_spec, b_out_spec], # W_o, b_o
        out_specs=out_spec,
        compiler_params=pltpu.CompilerParams(
            dimension_semantics=("parallel", "parallel", "arbitrary"),
            vmem_limit_bytes=vmem_limit),
        cost_estimate=cost,
    )(Q, K, V, wq_h, bq_h, wk_h, bk_h, wv_h, bv_h, wo_h, bo_f)


def _reference_mha(Q, K, V, params, *, num_heads):
    """Pure-JAX f32 reference reproducing the PyTorch forward."""
    B, S, D = Q.shape
    d_k = D // num_heads
    wq, bq, wk, bk, wv, bv, wo, bo = params

    def split_heads(x):
        return x.reshape(B, S, num_heads, d_k).transpose(0, 2, 1, 3)

    q = split_heads(Q @ wq + bq)
    k = split_heads(K @ wk + bk)
    v = split_heads(V @ wv + bv)
    scores = jnp.einsum('bhqd,bhkd->bhqk', q, k) / math.sqrt(d_k)
    probs = jax.nn.softmax(scores, axis=-1)
    attn = jnp.einsum('bhqk,bhkd->bhqd', probs, v)
    attn = attn.transpose(0, 2, 1, 3).reshape(B, S, D)
    return attn @ wo + bo


if __name__ == "__main__":
    B, S, D, H = 2, 8, 32, 4  # batch, seq, d_model, num_heads  (d_k = 8)

    key = jax.random.PRNGKey(0)
    keys = jax.random.split(key, 11)

    Q = jax.random.normal(keys[0], (B, S, D), jnp.float32)
    K = jax.random.normal(keys[1], (B, S, D), jnp.float32)
    V = jax.random.normal(keys[2], (B, S, D), jnp.float32)

    # Deterministic parameter init (shapes from nn.Linear(d_model, d_model)).
    def lin(kw, kb):
        w = jax.random.normal(kw, (D, D), jnp.float32) / math.sqrt(D)
        b = jax.random.normal(kb, (1, D), jnp.float32) * 0.01
        return w, b

    wq, bq = lin(keys[3], keys[4])
    wk, bk = lin(keys[5], keys[6])
    wv, bv = lin(keys[7], keys[8])
    wo, bo = lin(keys[9], keys[10])
    params = (wq, bq, wk, bk, wv, bv, wo, bo)

    out = multi_head_attention(Q, K, V, params, num_heads=H)
    out = jax.block_until_ready(out)

    ref = _reference_mha(Q, K, V, params, num_heads=H)
    assert out.shape == (B, S, D)
    # bf16 MXU inputs + approx reciprocal -> loosened tolerance vs f32 reference.
    assert jnp.allclose(out, ref, atol=5e-2, rtol=5e-2), "mismatch vs reference"

    print("KERNEL_OK")
</pallas_src>

<mosaic_0001>
module attributes {stable_mosaic.version = 11 : i64} {
  func.func @_mha_head_kernel(%arg0: i32, %arg1: i32, %arg2: i32, %arg3: memref<1x8x32xf32, #tpu.memory_space<vmem>>, %arg4: memref<1x8x32xf32, #tpu.memory_space<vmem>>, %arg5: memref<1x8x32xf32, #tpu.memory_space<vmem>>, %arg6: memref<1x32x8xbf16, #tpu.memory_space<vmem>>, %arg7: memref<1x1x8xf32, #tpu.memory_space<vmem>>, %arg8: memref<1x32x8xbf16, #tpu.memory_space<vmem>>, %arg9: memref<1x1x8xf32, #tpu.memory_space<vmem>>, %arg10: memref<1x32x8xbf16, #tpu.memory_space<vmem>>, %arg11: memref<1x1x8xf32, #tpu.memory_space<vmem>>, %arg12: memref<1x8x32xbf16, #tpu.memory_space<vmem>>, %arg13: memref<1x32xf32, #tpu.memory_space<vmem>>, %arg14: memref<1x8x32xf32, #tpu.memory_space<vmem>>) attributes {dimension_semantics = [#tpu.dimension_semantics<parallel>, #tpu.dimension_semantics<parallel>, #tpu.dimension_semantics<arbitrary>], iteration_bounds = array<i64: 2, 1, 4>, scalar_prefetch = 0 : i64, scratch_operands = 0 : i64, tpu.core_type = #tpu.core_type<tc>, window_params = [{transform_indices = @transform_0, window_bounds = array<i64: 1, 8, 32>}, {transform_indices = @transform_1, window_bounds = array<i64: 1, 8, 32>}, {transform_indices = @transform_2, window_bounds = array<i64: 1, 8, 32>}, {transform_indices = @transform_3, window_bounds = array<i64: 1, 32, 8>}, {transform_indices = @transform_4, window_bounds = array<i64: 1, 1, 8>}, {transform_indices = @transform_5, window_bounds = array<i64: 1, 32, 8>}, {transform_indices = @transform_6, window_bounds = array<i64: 1, 1, 8>}, {transform_indices = @transform_7, window_bounds = array<i64: 1, 32, 8>}, {transform_indices = @transform_8, window_bounds = array<i64: 1, 1, 8>}, {transform_indices = @transform_9, window_bounds = array<i64: 1, 8, 32>}, {pipeline_mode = #tpu.pipeline_mode<synchronous>, transform_indices = @transform_10, window_bounds = array<i64: 1, 32>}, {transform_indices = @transform_11, window_bounds = array<i64: 1, 8, 32>}]} {
    %c0 = arith.constant 0 : index
    %c0_0 = arith.constant 0 : index
    %c0_1 = arith.constant 0 : index
    %0 = vector.load %arg3[%c0, %c0_0, %c0_1] : memref<1x8x32xf32, #tpu.memory_space<vmem>>, vector<1x8x32xf32>
    %1 = vector.shape_cast %0 : vector<1x8x32xf32> to vector<8x32xf32>
    %2 = arith.truncf %1 : vector<8x32xf32> to vector<8x32xbf16>
    %c0_2 = arith.constant 0 : index
    %c0_3 = arith.constant 0 : index
    %c0_4 = arith.constant 0 : index
    %3 = vector.load %arg4[%c0_2, %c0_3, %c0_4] : memref<1x8x32xf32, #tpu.memory_space<vmem>>, vector<1x8x32xf32>
    %4 = vector.shape_cast %3 : vector<1x8x32xf32> to vector<8x32xf32>
    %5 = arith.truncf %4 : vector<8x32xf32> to vector<8x32xbf16>
    %c0_5 = arith.constant 0 : index
    %c0_6 = arith.constant 0 : index
    %c0_7 = arith.constant 0 : index
    %6 = vector.load %arg5[%c0_5, %c0_6, %c0_7] : memref<1x8x32xf32, #tpu.memory_space<vmem>>, vector<1x8x32xf32>
    %7 = vector.shape_cast %6 : vector<1x8x32xf32> to vector<8x32xf32>
    %8 = arith.truncf %7 : vector<8x32xf32> to vector<8x32xbf16>
    %c0_8 = arith.constant 0 : index
    %c0_9 = arith.constant 0 : index
    %c0_10 = arith.constant 0 : index
    %9 = vector.load %arg6[%c0_8, %c0_9, %c0_10] : memref<1x32x8xbf16, #tpu.memory_space<vmem>>, vector<1x32x8xbf16>
    %10 = vector.shape_cast %9 : vector<1x32x8xbf16> to vector<32x8xbf16>
    %cst = arith.constant dense<0.000000e+00> : vector<8x8xf32>
    %11 = tpu.matmul %2, %10, %cst {dimension_numbers = #tpu.dot_dimension_numbers<[1], [0], [0], [1], [0, 0, 1, 1], [], []>} : vector<8x32xbf16>, vector<32x8xbf16>, vector<8x8xf32> -> vector<8x8xf32>
    %c0_11 = arith.constant 0 : index
    %c0_12 = arith.constant 0 : index
    %c0_13 = arith.constant 0 : index
    %12 = vector.load %arg7[%c0_11, %c0_12, %c0_13] : memref<1x1x8xf32, #tpu.memory_space<vmem>>, vector<1x1x8xf32>
    %13 = vector.shape_cast %12 : vector<1x1x8xf32> to vector<1x8xf32>
    %14 = vector.broadcast %13 : vector<1x8xf32> to vector<8x8xf32>
    %15 = arith.addf %11, %14 : vector<8x8xf32>
    %c0_14 = arith.constant 0 : index
    %c0_15 = arith.constant 0 : index
    %c0_16 = arith.constant 0 : index
    %16 = vector.load %arg8[%c0_14, %c0_15, %c0_16] : memref<1x32x8xbf16, #tpu.memory_space<vmem>>, vector<1x32x8xbf16>
    %17 = vector.shape_cast %16 : vector<1x32x8xbf16> to vector<32x8xbf16>
    %cst_17 = arith.constant dense<0.000000e+00> : vector<8x8xf32>
    %18 = tpu.matmul %5, %17, %cst_17 {dimension_numbers = #tpu.dot_dimension_numbers<[1], [0], [0], [1], [0, 0, 1, 1], [], []>} : vector<8x32xbf16>, vector<32x8xbf16>, vector<8x8xf32> -> vector<8x8xf32>
    %c0_18 = arith.constant 0 : index
    %c0_19 = arith.constant 0 : index
    %c0_20 = arith.constant 0 : index
    %19 = vector.load %arg9[%c0_18, %c0_19, %c0_20] : memref<1x1x8xf32, #tpu.memory_space<vmem>>, vector<1x1x8xf32>
    %20 = vector.shape_cast %19 : vector<1x1x8xf32> to vector<1x8xf32>
    %21 = vector.broadcast %20 : vector<1x8xf32> to vector<8x8xf32>
    %22 = arith.addf %18, %21 : vector<8x8xf32>
    %c0_21 = arith.constant 0 : index
    %c0_22 = arith.constant 0 : index
    %c0_23 = arith.constant 0 : index
    %23 = vector.load %arg10[%c0_21, %c0_22, %c0_23] : memref<1x32x8xbf16, #tpu.memory_space<vmem>>, vector<1x32x8xbf16>
    %24 = vector.shape_cast %23 : vector<1x32x8xbf16> to vector<32x8xbf16>
    %cst_24 = arith.constant dense<0.000000e+00> : vector<8x8xf32>
    %25 = tpu.matmul %8, %24, %cst_24 {dimension_numbers = #tpu.dot_dimension_numbers<[1], [0], [0], [1], [0, 0, 1, 1], [], []>} : vector<8x32xbf16>, vector<32x8xbf16>, vector<8x8xf32> -> vector<8x8xf32>
    %c0_25 = arith.constant 0 : index
    %c0_26 = arith.constant 0 : index
    %c0_27 = arith.constant 0 : index
    %26 = vector.load %arg11[%c0_25, %c0_26, %c0_27] : memref<1x1x8xf32, #tpu.memory_space<vmem>>, vector<1x1x8xf32>
    %27 = vector.shape_cast %26 : vector<1x1x8xf32> to vector<1x8xf32>
    %28 = vector.broadcast %27 : vector<1x8xf32> to vector<8x8xf32>
    %29 = arith.addf %25, %28 : vector<8x8xf32>
    %cst_28 = arith.constant 0.353553385 : f32
    %30 = vector.broadcast %cst_28 : f32 to vector<8x8xf32>
    %31 = arith.mulf %15, %30 : vector<8x8xf32>
    %32 = arith.truncf %31 : vector<8x8xf32> to vector<8x8xbf16>
    %33 = arith.truncf %22 : vector<8x8xf32> to vector<8x8xbf16>
    %cst_29 = arith.constant dense<0.000000e+00> : vector<8x8xf32>
    %34 = tpu.matmul %32, %33, %cst_29 {dimension_numbers = #tpu.dot_dimension_numbers<[1], [1], [0], [0], [0, 0, 1, 0], [], []>} : vector<8x8xbf16>, vector<8x8xbf16>, vector<8x8xf32> -> vector<8x8xf32>
    %cst_30 = arith.constant dense<0xFF800000> : vector<8xf32>
    %35 = vector.multi_reduction <maximumf>, %34, %cst_30 [1] : vector<8x8xf32> to vector<8xf32>
    %36 = vector.shape_cast %35 : vector<8xf32> to vector<8x1xf32>
    %37 = vector.broadcast %36 : vector<8x1xf32> to vector<8x8xf32>
    %38 = arith.subf %34, %37 : vector<8x8xf32>
    %39 = math.exp %38 : vector<8x8xf32>
    %cst_31 = arith.constant dense<0.000000e+00> : vector<8xf32>
    %40 = vector.multi_reduction <add>, %39, %cst_31 [1] : vector<8x8xf32> to vector<8xf32>
    %41 = vector.shape_cast %40 : vector<8xf32> to vector<8x1xf32>
    %42 = tpu.reciprocal %41 {approx = true} : vector<8x1xf32> -> vector<8x1xf32>
    %43 = vector.broadcast %42 : vector<8x1xf32> to vector<8x8xf32>
    %44 = arith.mulf %39, %43 : vector<8x8xf32>
    %45 = arith.truncf %44 : vector<8x8xf32> to vector<8x8xbf16>
    %46 = arith.truncf %29 : vector<8x8xf32> to vector<8x8xbf16>
    %cst_32 = arith.constant dense<0.000000e+00> : vector<8x8xf32>
    %47 = tpu.matmul %45, %46, %cst_32 {dimension_numbers = #tpu.dot_dimension_numbers<[1], [0], [0], [1], [0, 0, 1, 1], [], []>} : vector<8x8xbf16>, vector<8x8xbf16>, vector<8x8xf32> -> vector<8x8xf32>
    %48 = arith.truncf %47 : vector<8x8xf32> to vector<8x8xbf16>
    %c0_33 = arith.constant 0 : index
    %c0_34 = arith.constant 0 : index
    %c0_35 = arith.constant 0 : index
    %49 = vector.load %arg12[%c0_33, %c0_34, %c0_35] : memref<1x8x32xbf16, #tpu.memory_space<vmem>>, vector<1x8x32xbf16>
    %50 = vector.shape_cast %49 : vector<1x8x32xbf16> to vector<8x32xbf16>
    %cst_36 = arith.constant dense<0.000000e+00> : vector<8x32xf32>
    %51 = tpu.matmul %48, %50, %cst_36 {dimension_numbers = #tpu.dot_dimension_numbers<[1], [0], [0], [1], [0, 0, 1, 1], [], []>} : vector<8x8xbf16>, vector<8x32xbf16>, vector<8x32xf32> -> vector<8x32xf32>
    %c0_i32 = arith.constant 0 : i32
    %52 = arith.cmpi eq, %arg2, %c0_i32 : i32
    %53 = arith.extui %52 : i1 to i32
    %c0_i32_37 = arith.constant 0 : i32
    %54 = arith.cmpi ne, %53, %c0_i32_37 : i32
    scf.if %54 {
      %c0_40 = arith.constant 0 : index
      %c0_41 = arith.constant 0 : index
      %58 = vector.load %arg13[%c0_40, %c0_41] : memref<1x32xf32, #tpu.memory_space<vmem>>, vector<1x32xf32>
      %59 = vector.broadcast %58 : vector<1x32xf32> to vector<8x32xf32>
      %60 = arith.addf %51, %59 : vector<8x32xf32>
      %c0_42 = arith.constant 0 : index
      %c0_43 = arith.constant 0 : index
      %c0_44 = arith.constant 0 : index
      %61 = vector.load %arg14[%c0_42, %c0_43, %c0_44] : memref<1x8x32xf32, #tpu.memory_space<vmem>>, vector<1x8x32xf32>
      %62 = vector.shape_cast %61 : vector<1x8x32xf32> to vector<8x32xf32>
      %63 = vector.shape_cast %60 : vector<8x32xf32> to vector<1x8x32xf32>
      tpu.vector_store %arg14[%c0_42, %c0_43, %c0_44], %63 {strides = array<i32>} : memref<1x8x32xf32, #tpu.memory_space<vmem>>, vector<1x8x32xf32>,
    } else {
    }
    %c0_i32_38 = arith.constant 0 : i32
    %55 = arith.cmpi ne, %arg2, %c0_i32_38 : i32
    %56 = arith.extui %55 : i1 to i32
    %c0_i32_39 = arith.constant 0 : i32
    %57 = arith.cmpi ne, %56, %c0_i32_39 : i32
    scf.if %57 {
      %c0_40 = arith.constant 0 : index
      %c0_41 = arith.constant 0 : index
      %c0_42 = arith.constant 0 : index
      %58 = vector.load %arg14[%c0_40, %c0_41, %c0_42] : memref<1x8x32xf32, #tpu.memory_space<vmem>>, vector<1x8x32xf32>
      %59 = vector.shape_cast %58 : vector<1x8x32xf32> to vector<8x32xf32>
      %60 = arith.addf %59, %51 : vector<8x32xf32>
      %c0_43 = arith.constant 0 : index
      %c0_44 = arith.constant 0 : index
      %c0_45 = arith.constant 0 : index
      %61 = vector.load %arg14[%c0_43, %c0_44, %c0_45] : memref<1x8x32xf32, #tpu.memory_space<vmem>>, vector<1x8x32xf32>
      %62 = vector.shape_cast %61 : vector<1x8x32xf32> to vector<8x32xf32>
      %63 = vector.shape_cast %60 : vector<8x32xf32> to vector<1x8x32xf32>
      tpu.vector_store %arg14[%c0_43, %c0_44, %c0_45], %63 {strides = array<i32>} : memref<1x8x32xf32, #tpu.memory_space<vmem>>, vector<1x8x32xf32>,
    } else {
    }
    return
  }
  func.func @transform_0(%arg0: i32, %arg1: i32, %arg2: i32) -> (i32, i32, i32) {
    %c0_i32 = arith.constant 0 : i32
    %c0_i32_0 = arith.constant 0 : i32
    return %arg0, %arg1, %c0_i32 : i32, i32, i32
  }
  func.func @transform_1(%arg0: i32, %arg1: i32, %arg2: i32) -> (i32, i32, i32) {
    %c0_i32 = arith.constant 0 : i32
    %c0_i32_0 = arith.constant 0 : i32
    %c0_i32_1 = arith.constant 0 : i32
    return %arg0, %c0_i32, %c0_i32_0 : i32, i32, i32
  }
  func.func @transform_2(%arg0: i32, %arg1: i32, %arg2: i32) -> (i32, i32, i32) {
    %c0_i32 = arith.constant 0 : i32
    %c0_i32_0 = arith.constant 0 : i32
    %c0_i32_1 = arith.constant 0 : i32
    return %arg0, %c0_i32, %c0_i32_0 : i32, i32, i32
  }
  func.func @transform_3(%arg0: i32, %arg1: i32, %arg2: i32) -> (i32, i32, i32) {
    %c0_i32 = arith.constant 0 : i32
    %c0_i32_0 = arith.constant 0 : i32
    %c0_i32_1 = arith.constant 0 : i32
    return %arg2, %c0_i32, %c0_i32_0 : i32, i32, i32
  }
  func.func @transform_4(%arg0: i32, %arg1: i32, %arg2: i32) -> (i32, i32, i32) {
    %c0_i32 = arith.constant 0 : i32
    %c0_i32_0 = arith.constant 0 : i32
    %c0_i32_1 = arith.constant 0 : i32
    return %arg2, %c0_i32, %c0_i32_0 : i32, i32, i32
  }
  func.func @transform_5(%arg0: i32, %arg1: i32, %arg2: i32) -> (i32, i32, i32) {
    %c0_i32 = arith.constant 0 : i32
    %c0_i32_0 = arith.constant 0 : i32
    %c0_i32_1 = arith.constant 0 : i32
    return %arg2, %c0_i32, %c0_i32_0 : i32, i32, i32
  }
  func.func @transform_6(%arg0: i32, %arg1: i32, %arg2: i32) -> (i32, i32, i32) {
    %c0_i32 = arith.constant 0 : i32
    %c0_i32_0 = arith.constant 0 : i32
    %c0_i32_1 = arith.constant 0 : i32
    return %arg2, %c0_i32, %c0_i32_0 : i32, i32, i32
  }
  func.func @transform_7(%arg0: i32, %arg1: i32, %arg2: i32) -> (i32, i32, i32) {
    %c0_i32 = arith.constant 0 : i32
    %c0_i32_0 = arith.constant 0 : i32
    %c0_i32_1 = arith.constant 0 : i32
    return %arg2, %c0_i32, %c0_i32_0 : i32, i32, i32
  }
  func.func @transform_8(%arg0: i32, %arg1: i32, %arg2: i32) -> (i32, i32, i32) {
    %c0_i32 = arith.constant 0 : i32
    %c0_i32_0 = arith.constant 0 : i32
    %c0_i32_1 = arith.constant 0 : i32
    return %arg2, %c0_i32, %c0_i32_0 : i32, i32, i32
  }
  func.func @transform_9(%arg0: i32, %arg1: i32, %arg2: i32) -> (i32, i32, i32) {
    %c0_i32 = arith.constant 0 : i32
    %c0_i32_0 = arith.constant 0 : i32
    %c0_i32_1 = arith.constant 0 : i32
    return %arg2, %c0_i32, %c0_i32_0 : i32, i32, i32
  }
  func.func @transform_10(%arg0: i32, %arg1: i32, %arg2: i32) -> (i32, i32) {
    %c0_i32 = arith.constant 0 : i32
    %c0_i32_0 = arith.constant 0 : i32
    %c0_i32_1 = arith.constant 0 : i32
    return %c0_i32, %c0_i32_0 : i32, i32
  }
  func.func @transform_11(%arg0: i32, %arg1: i32, %arg2: i32) -> (i32, i32, i32) {
    %c0_i32 = arith.constant 0 : i32
    %c0_i32_0 = arith.constant 0 : i32
    return %arg0, %arg1, %c0_i32 : i32, i32, i32
  }
}

</mosaic_0001>

<bundles_post_ra>
// kernel: tpu_custom_call.1
= control target key start
LH: loop header
LB: loop body
LE: loop exit
PB: predicated region body
PF: predicated region fallthrough
CT: control target
= control target key end

     0   :  { %s1452_s0 = inlined_call_operand.vmem [shape: f32[2,8,32], index: 0, kind: input, shape index: {}]   ;;  %s1453_s1 = inlined_call_operand.vmem [shape: f32[2,8,32], index: 1, kind: input, shape index: {}]   ;;  %s1454_s2 = inlined_call_operand.vmem [shape: f32[2,8,32], index: 2, kind: input, shape index: {}]   ;;  %s1455_s3 = inlined_call_operand.vmem [shape: bf16[4,32,8], index: 3, kind: input, shape index: {}]   ;;  %s1456_s4 = inlined_call_operand.vmem [shape: f32[4,1,8], index: 4, kind: input, shape index: {}]   ;;  %s1457_s5 = inlined_call_operand.vmem [shape: bf16[4,32,8], index: 5, kind: input, shape index: {}]   ;;  %s1458_s6 = inlined_call_operand.vmem [shape: f32[4,1,8], index: 6, kind: input, shape index: {}]   ;;  %s1459_s7 = inlined_call_operand.vmem [shape: bf16[4,32,8], index: 7, kind: input, shape index: {}]   ;;  %s1460_s8 = inlined_call_operand.vmem [shape: f32[4,1,8], index: 8, kind: input, shape index: {}]   ;;  %s1461_s9 = inlined_call_operand.vmem [shape: bf16[4,8,32], index: 9, kind: input, shape index: {}]   ;;  %s1462_s10 = inlined_call_operand.vmem [shape: f32[1,32], index: 10, kind: input, shape index: {}]   ;;  %s1463_s11 = inlined_call_operand.hbm [shape: f32[2,8,32], index: 11, kind: output, shape index: {}]  }
   0x1   :  { %1474 = sst [smem:[#allocation14_spill]] %s1456_s4 }
   0x2   :  { %1475 = sst [smem:[#allocation15_spill]] %s1463_s11 }
   0x3   :  { %16 = vsyncpa [#allocation3], 0 }
   0x4   :  { %18 = vsyncpa [#allocation3 + $0x1], 0  ;;  %s1266_s17 = smov 0   ;;  %s1268_s18 = smov 0  }
   0x5   :  { %s1270_s19 = smov 0   ;;  %s1272_s20 = smov 0  }
   0x6   :  { %s1274_s21 = smov 0   ;;  %s1276_s22 = smov 0  }
   0x7   :  { %s1278_s23 = smov 0   ;;  %s1280_s24 = smov 0  }
   0x8 LB: > { %1476 = sst [smem:[#allocation5_spill]] %s1176_s17  ;;  %s970_s25 = sadd.s32 4294967295, %s1204_s24   ;;  %s1204_s24 = sphi %s1280_s24, %s24_s24   ;;  %s1200_s23 = sphi %s1278_s23, %s1499_s23   ;;  %s1196_s22 = sphi %s1276_s22, %s1498_s22   ;;  %s1192_s21 = sphi %s1274_s21, %s1497_s21   ;;  %s1188_s20 = sphi %s1272_s20, %s1496_s20   ;;  %s1184_s19 = sphi %s1270_s19, %s1495_s19   ;;  %s1180_s18 = sphi %s1268_s18, %s1501_s18   ;;  %s1176_s17 = sphi %s1266_s17, %s1500_s17  }
   0x9   : > { %1477 = sst [smem:[#allocation6_spill]] %s1184_s19  ;;  %s971_s26 = sadd.s32 4294967294, %s1204_s24  }
   0xa   : > { %1478 = sst [smem:[#allocation7_spill]] %s1196_s22  ;;  %s36_s27 = sadd.s32 1, %s1196_s22 }
   0xb   : > { %1479 = sst [smem:[#allocation8_spill]] %s1200_s23  ;;  %p37_p0 = scmp.ge.s32.totalorder %s36_s27, 4 }
   0xc   : > { %1480 = sst [smem:[#allocation9_spill]] %s1204_s24  ;;  %s43_s28 = sadd.s32 1, %s1200_s23 }
   0xd   : > { %p345_p1 = scmp.ne.s32.totalorder %s1184_s19, %s1180_s18  ;;  %p346_p2 = scmp.eq.s32.totalorder %s970_s25, 7 }
   0xe   : > { %s1503_s27 = smov (%p37_p0, %s36_s27), 0  ;;  %s1505_s28 = smov (!%p37_p0, %s43_s28), %s1200_s23 }
   0xf   : > { %1481 = sst [smem:[#allocation10_spill]] %s1503_s27  ;;  %p1315_p3 = por %p346_p2, %p345_p1 }
  0x10   : > { %p351_p4 = scmp.ne.s32.totalorder %s1180_s18, %s1176_s17  ;;  %p45_p5 = scmp.ge.s32.totalorder %s1505_s28, 2 }
  0x11   : > { %p352_p6 = scmp.eq.s32.totalorder %s971_s26, 7  ;;  %p974_p7 = scmp.ge.s32.totalorder %s1204_s24, 1 }
  0x12   : > { %p446_p8 = scmp.lt.s32.totalorder %s1204_s24, 9  ;;  %s1507_s28 = smov (%p45_p5, %s1505_s28), 0 }
  0x13   : > { %1483 = sst [smem:[#allocation11_spill]] %s1507_s28  ;;  %p1325_p9 = por %p352_p6, %p351_p4 }
  0x14   : > { %p447_p10 = pnand %p974_p7, %p446_p8  ;;  %s330_s12 = ssub.s32 %s1200_s23, %s1507_s28 }
  0x15   : > { %s1484_s30 = scalar_select %p1325_p9, 1, 0 }
  0x16   : > { %s335_s13 = sadd.s32 1, %s1184_s19  ;;  %p333_p11 = scmp.eq.s32.totalorder %s330_s12, 0 }
  0x17   : > { %1485 = sst [smem:[#allocation12_spill]] %s1484_s30  ;;  %450 = sbr.rel (%p447_p10) target bundleno = 864 (0x360), region = 64 }
  0x18   : > { %s1333_s14 = scalar_select %p333_p11, %s1184_s19, %s335_s13  }
  0x19   : > { %s1467_s15 = sand.u32 (!%p447_p10), 1, %s1180_s18   ;;  %p539_p12 = scmp.lt.s32.totalorder (!%p447_p10), %s1188_s20, 3 }
  0x1a   : > { %1486 = sst [smem:[#allocation13_spill]] %s1333_s14  ;;  %s1339_s16 = sshll.u32 (!%p447_p10), %s1467_s15, 3 }
  0x1b   : > { %p524_p13 = scmp.lt.s32.totalorder (!%p447_p10), %s1192_s21, 1  ;;  %s1487_s4 = sld [smem:[#allocation14_spill]] (!%p447_p10) }
  0x1c   : > { %s1343_s25 = scalar_select %p539_p12, %s1188_s20, 3  ;;  %vm594_vm0 = vcmask 261120   ;;  %vm686_vm1 = vcmask 64512   ;;  %vm722_vm2 = vcmask 1043456  }
  0x1d   : > { %s525_s26 = scalar_select %p524_p13, %s1192_s21, 1 }
  0x1e   : > { %s1347_s12 = sshll.u32 %s1343_s25, 4  ;;  %s554_s14 = scalar_lea.vmem %s1458_s6, %s1343_s25 }
  0x1f   : > { %s543_s15 = scalar_lea.vmem %s1455_s3, %s1347_s12  ;;  %s551_s30 = scalar_lea.vmem %s1457_s5, %s1347_s12  ;;  %v1103_v9 = vld [vmem:[%s554_s14] ss:$0 sm:$0xff] }
  0x20   : > { %v1026_v0 = vld [vmem:[%s543_s15 + $0x8] sm:$0xff]  ;;  %s1361_s17 = sshll.u32 %s525_s26, 3  ;;  %v1025_v2 = vld [vmem:[%s543_s15] sm:$0xff]  ;;  %s559_s24 = scalar_lea.vmem %s1459_s7, %s1347_s12 }
  0x21   : > { %s546_s27 = scalar_lea.vmem %s1487_s4, %s1343_s25  ;;  %v1028_v1 = vld [vmem:[%s551_s30 + $0x8] sm:$0xff]  ;;  %s530_s13 = scalar_lea.vmem %s1452_s0, %s1361_s17  ;;  %604 = vmatpush.bf16.msra.mxu0 %v1026_v0  ;;  %v1027_v3 = vld [vmem:[%s551_s30] sm:$0xff] }
  0x22   : > { %s534_s22 = scalar_lea.vmem %s1453_s1, %s1361_s17  ;;  %640 = vmatpush.bf16.msra.mxu1 %v1028_v1  ;;  %v568_v4 = vld [vmem:[%s530_s13] sm:$0xff]  ;;  %s538_s15 = scalar_lea.vmem %s1454_s2, %s1361_s17  ;;  %v1030_v20 = vld [vmem:[%s559_s24 + $0x8] sm:$0xff] }
  0x23   : > { %v570_v5 = vld [vmem:[%s534_s22] sm:$0xff]  ;;  %v569_v6 = vpack.c.bf16 %v568_v4, %v568_v4  ;;  %676 = vmatpush.bf16.msra.mxu2 %v1030_v20  ;;  %s562_s12 = scalar_lea.vmem %s1460_s8, %s1343_s25  ;;  %s985_s17 = sshll.u32 %s1343_s25, 2 }
  0x24   : > { %v571_v7 = vpack.c.bf16 %v570_v5, %v570_v5  ;;  %v1102_v8 = vld [vmem:[%s546_s27] ss:$0 sm:$0xff]  ;;  %s566_s19 = scalar_lea.vmem %s1461_s9, %s985_s17  ;;  %s523_s25 = scalar_lea.vmem [#allocation2], %s1339_s16 }
  0x25   : > { %605 = vmatpush.bf16.msra.mxu0 %v1025_v2  ;;  %v1029_v21 = vld [vmem:[%s559_s24] sm:$0xff]  ;;  %p1016_p0 = scmp.ne.s32.totalorder %s1188_s20, 0 }
  0x26   : > { %641 = vmatpush.bf16.msra.mxu1 %v1027_v3  ;;  %v572_v22 = vld [vmem:[%s538_s15] sm:$0xff] }
  0x27   : > { %v573_v23 = vpack.c.bf16 %v572_v22, %v572_v22  ;;  %677 = vmatpush.bf16.msra.mxu2 %v1029_v21  ;;  %v1104_v27 = vld [vmem:[%s562_s12] ss:$0 sm:$0xff] }
  0x28   : > { %994 = vmatmul.msk.bf16.vlgmr.msra.gmra.mxu0 %vm594_vm0, %v569_v6  ;;  %v740_v38 = vld [vmem:[%s566_s19] sm:$0xf] }
  0x29   : > { %1003 = vmatmul.msk.bf16.vlgmr.msra.gmra.mxu1 %vm594_vm0, %v571_v7  ;;  %v745_v39 = vsel %vm722_vm2, %v740_v38, 0 }
  0x2a   : > { %1012 = vmatmul.msk.bf16.vlgmr.msra.gmra.mxu2 %vm594_vm0, %v573_v23  ;;  %754 = vmatpush.bf16.msrb.mxu1 %v745_v39 }
  0xa5   : > { %v607_v10 = vpop.f32.mrf.mxu0 }
  0xa6   : > { %v643_v11 = vpop.f32.mrf.mxu1  ;;  %v608_v12 = vadd.f32 %v1102_v8, %v607_v10 }
  0xa7   : > { %v644_v13 = vadd.f32 %v1103_v9, %v643_v11 }
  0xa8   : > { %v683_v15 = vmul.f32 0.35355338, %v608_v12 }
  0xa9   : > { %v685_v14 = vpack.c.bf16 %v644_v13, %v644_v13 }
  0xaa   : > { %v684_v19 = vpack.c.bf16 %v683_v15, %v683_v15 }
  0xab   : > { %v691_v16 = vsel %vm686_vm1, %v685_v14, 0 }
  0xac   : > { %700 = vmatpush.bf16.xpose.msra.mxu3 %v691_v16 }
  0xad   : > { %v609_v17 = vpop.f32.mrf.mxu0  ;;  %v679_v28 = vpop.f32.mrf.mxu2 }
  0xae   : > { %v645_v18 = vpop.f32.mrf.mxu1  ;;  %v680_v30 = vadd.f32 %v1104_v27, %v679_v28 }
  0xb0   : > { %v718_v32 = vpack.c.bf16 %v680_v30, %v680_v30 }
  0xb2   : > { %v724_v34 = vsel %vm722_vm2, %v718_v32, 0 }
  0xb3   : > { %1013 = vmatmul.msk.bf16.vlgmr.msra.gmra.mxu3 %vm686_vm1, %v684_v19  ;;  %733 = vmatpush.bf16.msrb.mxu0 %v724_v34 }
  0xb5   : > { %v681_v35 = vpop.f32.mrf.mxu2 }
 0x136   : > { %v702_v24 = vpop.f32.mrf.mxu3 }
 0x137   : > { %v706_v25 = vsel %vm686_vm1, %v702_v24, -inf }
 0x138   : > { %707 = vmax.xlane.f32.xlu0 %v706_v25 }
 0x13e   : > { %v704_v26 = vpop.f32.mrf.mxu3 }
 0x1ab   : > { %v708_v29 = vpop.xlane.xlu0 %707 }
 0x1ac   : > { %v709_v31 = vsub.f32 %v702_v24, %v708_v29 }
 0x1ae   : > { %v710_v33 = vmul.f32 1.442695, %v709_v31 }
 0x1b0   : > { %1105 = vpow2.f32 %v710_v33 }
 0x1b6   : > { %v1106_v36 = vpop.eup %1105 }
 0x1b7   : > { %v712_v37 = vsel %vm686_vm1, %v1106_v36, 0.0 }
 0x1b8   : > { %713 = vadd.xlane.f32.xlu0 %v712_v37 }
 0x22b   : > { %v714_v40 = vpop.xlane.xlu0 %713 }
 0x22c   : > { %1107 = vrcp.f32 %v714_v40 }
 0x232   : > { %v1108_v41 = vpop.eup %1107 }
 0x233   : > { %v716_v42 = vmul.f32 %v1108_v41, %v1106_v36 }
 0x235   : > { %v717_v43 = vpack.c.bf16 %v716_v42, %v716_v42 }
 0x237   : > { %1014 = vmatmul.msk.bf16.vlgmr.msrb.gmra.mxu0 %vm686_vm1, %v717_v43 }
 0x2b4   : > { %v735_v44 = vpop.f32.mrf.mxu0 }
 0x2b5   : > { %v739_v45 = vpack.c.bf16 %v735_v44, %v735_v44 }
 0x2b7   : > { %1015 = vmatmul.msk.bf16.vlgmr.msrb.gmra.mxu1 %vm686_vm1, %v739_v45 }
 0x2bc   : > { %v737_v46 = vpop.f32.mrf.mxu0 }
 0x334   : > { %v756_v47 = vpop.f32.mrf.mxu1 }
 0x338   : > { %763 = sbr.rel (%p1016_p0) target bundleno = 833 (0x341), region = 68 }
 0x33c   : > { %v758_v48 = vpop.f32.mrf.mxu1 }
 0x33d   : > { %v1109_v49 = vld [vmem:[%s1462_s10] ss:$0 sm:$0xff] }
 0x33e   : > { %v768_v50 = vadd.f32 %v1109_v49, %v756_v47 }
 0x340   : > { %769 = vst.msk [vmem:[%s523_s25] sm:$0xff] %vm594_vm0, %v768_v50 }
 0x341 PF: > { %p1017_p1 = scmp.eq.s32.totalorder %s1188_s20, 0 }
 0x343   : > { %773 = sbr.rel (%p1017_p1) target bundleno = 844 (0x34c), region = 72 }
 0x348   : > { %v774_v51 = vld [vmem:[%s523_s25] sm:$0xff] }
 0x349   : > { %v775_v52 = vadd.f32 %v774_v51, %v756_v47 }
 0x34b   : > { %776 = vst.msk [vmem:[%s523_s25] sm:$0xff] %vm594_vm0, %v775_v52 }
 0x34c PF: > { %s1019_s16 = sshll.u32 %s1192_s21, 3  ;;  %s1488_s24 = sld [smem:[#allocation15_spill]] }
 0x34d   : > { %s791_s15 = sshll.u32 %s523_s25, 4  ;;  %s1490_s28 = sand.u32 1, %s1180_s18   ;;  %s792_s15 = int_to_ptr.vmem [resolvable:$true] %s791_s15 }
 0x34e   : > { %s778_s20 = scalar_lea.sflag [#allocation3], %s1490_s28 }
 0x352   : > { %s1489_s27 = smov %s1488_s24  ;;  %s789_s30 = scalar_lea.hbm %s1488_s24, %s1019_s16 }
 0x353   : > { %s793_s26 = sshll.u32 %s789_s30, 4  ;;  %s1130_s21 = scalar_lea.hbm %s1489_s27, 16  ;;  %s794_s26 = int_to_ptr.hbm [resolvable:$true] %s793_s26 }
 0x354   : > { %s1124_s12 = sshra.s32 %s794_s26, 4  ;;  %s1125_s12 = int_to_ptr.hbm [resolvable:$true] %s1124_s12 }
 0x355   : > { %s1126_s17 = scalar_lea.hbm %s1125_s12, 8  ;;  %p1131_p6 = scmp.lt.s32.totalorder %s1125_s12, %s1489_s27 }
 0x356   : > { %p1127_p2 = scmp.ne.s32.totalorder %s1125_s12, %s1126_s17  ;;  %p1132_p7 = scmp.lt.s32.totalorder %s1130_s21, %s1126_s17 }
 0x358   : > { %p1128_p4 = pnand %p1127_p2, %p1315_p3  ;;  %p1133_p8 = por %p1132_p7, %p1131_p6 }
 0x35a   : > { %p1129_p5 = pneg %p1128_p4 }
 0x35c   : > { %p1134_p10 = pnand %p1133_p8, %p1129_p5 }
 0x35e   : > { %1137 = shalt.err (!%p1134_p10)
}
 0x35f   : > { %1031 = dma.vmem_to_hbm [thread:$0]  (%p1315_p3), %s792_s15, 128, %s794_s26, %s778_s20  }
 0x360 PF: > { %s1491_s25 = sld [smem:[#allocation9_spill]] }
 0x361   : > { %s1492_s14 = sld [smem:[#allocation5_spill]] }
 0x366   : > { %p1037_p11 = scmp.ge.s32.totalorder %s1491_s25, 2 }
 0x367   : > { %s805_s4 = sand.u32 1, %s1492_s14  }
 0x368   : > { %p1034_p12 = pnand %p1037_p11, %p1325_p9  ;;  %s806_s11 = scalar_lea.sflag [#allocation3], %s805_s4 }
 0x36a   : > { %p1035_p13 = pneg %p1034_p12 }
 0x36c   : > { %1171 = dma.done.wait (%p1035_p13), %s806_s11, 128  }
 0x36d   : > { %1173 = vsyncadd (%p1035_p13), %s806_s11, 4294967168  ;;  %s24_s24 = sadd.s32 1, %s1491_s25   ;;  %s1494_s30 = sld [smem:[#allocation6_spill]] }
 0x36e   : > { %p21_p0 = scmp.ge.s32.totalorder %s24_s24, 10   ;;  %s1495_s19 = sld [smem:[#allocation13_spill]] }
 0x36f   : > { %s1496_s20 = sld [smem:[#allocation7_spill]]  ;;  %s1500_s17 = smov %s1180_s18 }
 0x370   : > { %s1497_s21 = sld [smem:[#allocation8_spill]]  ;;  %23 = sbr.rel (!%p21_p0) target bundleno = 8 (0x8), region = 134 }
 0x371   : > { %s1498_s22 = sld [smem:[#allocation10_spill]] }
 0x372   : > { %s1499_s23 = sld [smem:[#allocation11_spill]] }
 0x373   : > { %s1501_s18 = smov %s1494_s30 }
 0x375   :  { %812 = vsyncpa [#allocation3], 1 }
 0x376   :  { %814 = vsyncpa [#allocation3 + $0x1], 1 }

</bundles_post_ra>
